<compile_context>
chip_gen: v6e
topology: v6e:2x2x1
jax: 0.10.0
libtpu: 0.0.40
codegen_flags: <defaults>
</compile_context>

<pallas_src>
import functools
import math

import jax
import jax.numpy as jnp
from jax.experimental import pallas as pl
from jax.experimental.pallas import tpu as pltpu


_INV_SQRT2 = 1.0 / math.sqrt(2.0)
_SQRT_2_OVER_PI = math.sqrt(2.0 / math.pi)


# ----------------------------- device heuristics ----------------------------

def _tpu_generation():
    try:
        kind = jax.devices()[0].device_kind.lower()
    except Exception:
        return 0
    for g in (7, 6, 5, 4, 3, 2):
        if f"v{g}" in kind:
            return g
    return 0


# ----------------------------- in-kernel math -------------------------------

def _gelu_tanh(x):
    # tanh-approximate GELU: 0.5*x*(1 + tanh(sqrt(2/pi)*(x + 0.044715*x^3))).
    # ~6 VALU ops + 1 EUP tanh per element; max abs error vs exact erf ~1e-3,
    # far inside the bf16-matmul noise floor.
    inner = _SQRT_2_OVER_PI * x * (1.0 + 0.044715 * x * x)
    return 0.5 * x * (1.0 + jnp.tanh(inner))


def _gelu_erf(x):
    # Exact-erf GELU via the Abramowitz-Stegun 7.1.26 polynomial folded into
    # Phi(x); kept for callers that need erf fidelity (exact_gelu=True).
    a1, a2, a3, a4, a5 = (0.254829592, -0.284496736, 1.421413741,
                          -1.453152027, 1.061405429)
    p = 0.3275911
    z = jnp.abs(x) * _INV_SQRT2
    t = pl.reciprocal(1.0 + p * z, approx=True)        # EUP slot, ~free
    poly = ((((a5 * t + a4) * t + a3) * t + a2) * t + a1) * t
    tail = 0.5 * poly * jnp.exp(-z * z)
    phi = jnp.where(x < 0.0, tail, 1.0 - tail)
    return x * phi


# ------------------------------ Pallas kernel -------------------------------

def trace_mlp_kernel(xT_ref,
                     w0_ref, b0_ref,
                     w1_ref, b1_ref,
                     w2_ref, b2_ref,
                     w3_ref, b3_ref,
                     out_ref,
                     *, compute_dtype, gelu_fn):
    def to_mxu(h):
        # bf16 MXU inputs; no-op when elementwise math is already bf16.
        return h if h.dtype == jnp.bfloat16 else h.astype(jnp.bfloat16)

    xT = xT_ref[...]                                    # (4, TB)  f32

    # ---- layer 0: (4 -> H) as 4 VPU broadcast-FMAs (K=4 would waste the MXU)
    w0 = w0_ref[...]                                    # (H, 4)   f32
    h = (w0[:, 0:1] * xT[0:1, :] +
         w0[:, 1:2] * xT[1:2, :] +
         w0[:, 2:3] * xT[2:3, :] +
         w0[:, 3:4] * xT[3:4, :] +
         b0_ref[...])                                   # (H, TB)  f32
    h = gelu_fn(h.astype(compute_dtype))

    # ---- layers 1 & 2: (H -> H) bf16 MXU matmuls, f32 accumulation ----
    h = jnp.dot(w1_ref[...], to_mxu(h),
                preferred_element_type=jnp.float32) + b1_ref[...]
    h = gelu_fn(h.astype(compute_dtype))

    h = jnp.dot(w2_ref[...], to_mxu(h),
                preferred_element_type=jnp.float32) + b2_ref[...]
    h = gelu_fn(h.astype(compute_dtype))

    # ---- layer 3: (H -> 1) as VPU broadcast-multiply + sublane reduction ----
    # (an M=1 matmul streams all TB columns through the MXU for one output row)
    w3c = w3_ref[...].astype(compute_dtype)             # (H, 1)
    logits = jnp.sum((w3c * h).astype(jnp.float32),
                     axis=0, keepdims=True) + b3_ref[...]   # (1, TB) f32
    out_ref[...] = 1.0 / (1.0 + jnp.exp(-logits))       # lane-dense (1, TB)


# -------------------------------- wrapper -----------------------------------

def _round_up(n, m):
    return ((n + m - 1) // m) * m


def trace_model_forward(x, params, labels=None, *, block_b=None,
                        exact_gelu=False):
    """Pallas port of TraceModel.forward.  x: (B, 4) float32."""
    w0, b0, w1, b1, w2, b2, w3, b3 = params
    B = x.shape[0]
    H = w0.shape[0]

    gen = _tpu_generation()
    # bf16 VALU/EUP exist on v6e/v7x only; v5e (and unknown) keep f32 elementwise.
    compute_dtype = jnp.bfloat16 if gen >= 6 else jnp.float32
    n_cores = 2 if gen >= 7 else 1
    if block_b is None:
        block_b = 8192 if gen >= 6 else 2048   # v5e: cap tile (f32 temps, 1 vst slot)
    block_b = max(128, (block_b // 128) * 128)

    # Batch lives on the lane axis: tile of `tb` lanes, input padded to full grid.
    tb = min(block_b, _round_up(B, 128))
    b_pad = _round_up(B, tb)
    # v7x megacore: make sure each TensorCore gets at least one batch tile.
    while n_cores > 1 and b_pad // tb < n_cores and tb > 128:
        tb = _round_up(tb // 2, 128)
        b_pad = _round_up(B, tb)

    xT = jnp.pad(x.T.astype(jnp.float32), ((0, 0), (0, b_pad - B)))   # (4, b_pad)
    w3_col = w3.astype(jnp.float32).reshape(H, 1)        # column for VPU head

    def resident(a):   # whole-array block, constant block index -> no re-DMA
        nd = a.ndim
        return pl.BlockSpec(a.shape, lambda i, nd=nd: (0,) * nd)

    weight_bytes = sum(int(p.size) * p.dtype.itemsize
                       for p in (w0, b0, w1, b1, w2, b2, w3, b3))
    cost = pl.CostEstimate(
        flops=int(2 * B * (2 * H * H + 5 * H)),
        transcendentals=int(B * (3 * H + 1)),
        bytes_accessed=int(4 * (4 * B + B)) + weight_bytes,
    )

    kernel = functools.partial(
        trace_mlp_kernel,
        compute_dtype=compute_dtype,
        gelu_fn=_gelu_erf if exact_gelu else _gelu_tanh,
    )

    out = pl.pallas_call(
        kernel,
        out_shape=jax.ShapeDtypeStruct((1, b_pad), jnp.float32),
        grid=(b_pad // tb,),
        in_specs=[pl.BlockSpec((4, tb), lambda i: (0, i)),
                  resident(w0), resident(b0),
                  resident(w1), resident(b1),
                  resident(w2), resident(b2),
                  resident(w3_col), resident(b3)],
        out_specs=pl.BlockSpec((1, tb), lambda i: (0, i)),
        compiler_params=pltpu.CompilerParams(
            dimension_semantics=("parallel",)),
        cost_estimate=cost,
    )(xT, w0, b0, w1, b1, w2, b2, w3_col, b3)

    net = out[0, :B]                     # torch.squeeze: (B, 1)-equivalent -> (B,)
    result = {'output': net, 'predictions': net > 0.5}
    if labels is not None:
        # nn.BCELoss (mean reduction, log clamped at -100 like torch).
        lbl = labels.astype(jnp.float32)
        log_p = jnp.maximum(jnp.log(net), -100.0)
        log_1mp = jnp.maximum(jnp.log(1.0 - net), -100.0)
        result['loss'] = -jnp.mean(lbl * log_p + (1.0 - lbl) * log_1mp)
    return result


def init_params(key, hidden=32, in_features=4):
    """nn.Linear-style U(-1/sqrt(fan_in), +bound) init in kernel-ready layout:
    weights in PyTorch's native (out, in) orientation; hidden-layer weights
    pre-cast to bf16 for the MXU (documented quantization vs an f32 torch
    checkpoint); biases as (out, 1) columns since batch is the lane axis."""
    def linear(k, fan_in, fan_out, w_dtype):
        kw, kb = jax.random.split(k)
        bound = 1.0 / math.sqrt(fan_in)
        w = jax.random.uniform(kw, (fan_out, fan_in), jnp.float32, -bound, bound)
        b = jax.random.uniform(kb, (fan_out, 1), jnp.float32, -bound, bound)
        return w.astype(w_dtype), b

    k0, k1, k2, k3 = jax.random.split(key, 4)
    w0, b0 = linear(k0, in_features, hidden, jnp.float32)   # layer 0 stays on VPU
    w1, b1 = linear(k1, hidden, hidden, jnp.bfloat16)
    w2, b2 = linear(k2, hidden, hidden, jnp.bfloat16)
    w3, b3 = linear(k3, hidden, 1, jnp.float32)              # VPU head -> keep f32
    return (w0, b0, w1, b1, w2, b2, w3, b3)


def _reference_forward(x, params):
    """Pure-JAX f32 exact-erf reference (same bf16-rounded hidden weights)."""
    w0, b0, w1, b1, w2, b2, w3, b3 = [p.astype(jnp.float32) for p in params]
    h = jax.nn.gelu(x @ w0.T + b0[:, 0], approximate=False)
    h = jax.nn.gelu(h @ w1.T + b1[:, 0], approximate=False)
    h = jax.nn.gelu(h @ w2.T + b2[:, 0], approximate=False)
    return jax.nn.sigmoid(h @ w3.T + b3[:, 0])[:, 0]


if __name__ == "__main__":
    key = jax.random.PRNGKey(0)
    k_params, k_x, k_lbl = jax.random.split(key, 3)

    B, HIDDEN = 200, 32          # B deliberately not a multiple of the 128-lane tile
    params = init_params(k_params, hidden=HIDDEN, in_features=4)
    x = jax.random.normal(k_x, (B, 4), jnp.float32)
    labels = (jax.random.uniform(k_lbl, (B,)) > 0.5).astype(jnp.float32)

    ref = _reference_forward(x, params)

    # 1) small tile -> grid=(2,) so the multi-tile / padding path is exercised.
    fwd_small = jax.jit(functools.partial(trace_model_forward, block_b=128))
    out = fwd_small(x, params, labels)
    jax.block_until_ready(out['output'])
    jax.block_until_ready(out['loss'])

    assert out['output'].shape == (B,)
    assert out['predictions'].shape == (B,) and out['predictions'].dtype == jnp.bool_
    assert bool(jnp.isfinite(out['loss']))
    max_err = float(jnp.max(jnp.abs(out['output'] - ref)))
    assert max_err < 5e-2, f"max abs err vs reference (block_b=128): {max_err}"

    # 2) default auto-sized tile (production config: large lane-dense tile).
    fwd_auto = jax.jit(trace_model_forward)
    out2 = fwd_auto(x, params, labels)
    jax.block_until_ready(out2['output'])
    max_err2 = float(jnp.max(jnp.abs(out2['output'] - ref)))
    assert max_err2 < 5e-2, f"max abs err vs reference (auto tile): {max_err2}"

    print("KERNEL_OK")
</pallas_src>

<mosaic_0001>
module attributes {stable_mosaic.version = 11 : i64} {
  func.func @trace_mlp_kernel(%arg0: i32, %arg1: memref<4x128xf32, #tpu.memory_space<vmem>>, %arg2: memref<32x4xf32, #tpu.memory_space<vmem>>, %arg3: memref<32x1xf32, #tpu.memory_space<vmem>>, %arg4: memref<32x32xbf16, #tpu.memory_space<vmem>>, %arg5: memref<32x1xf32, #tpu.memory_space<vmem>>, %arg6: memref<32x32xbf16, #tpu.memory_space<vmem>>, %arg7: memref<32x1xf32, #tpu.memory_space<vmem>>, %arg8: memref<32x1xf32, #tpu.memory_space<vmem>>, %arg9: memref<1x1xf32, #tpu.memory_space<vmem>>, %arg10: memref<1x128xf32, #tpu.memory_space<vmem>>) attributes {dimension_semantics = [#tpu.dimension_semantics<parallel>], iteration_bounds = array<i64: 2>, scalar_prefetch = 0 : i64, scratch_operands = 0 : i64, tpu.core_type = #tpu.core_type<tc>, window_params = [{transform_indices = @transform_0, window_bounds = array<i64: 4, 128>}, {pipeline_mode = #tpu.pipeline_mode<synchronous>, transform_indices = @transform_1, window_bounds = array<i64: 32, 4>}, {pipeline_mode = #tpu.pipeline_mode<synchronous>, transform_indices = @transform_2, window_bounds = array<i64: 32, 1>}, {pipeline_mode = #tpu.pipeline_mode<synchronous>, transform_indices = @transform_3, window_bounds = array<i64: 32, 32>}, {pipeline_mode = #tpu.pipeline_mode<synchronous>, transform_indices = @transform_4, window_bounds = array<i64: 32, 1>}, {pipeline_mode = #tpu.pipeline_mode<synchronous>, transform_indices = @transform_5, window_bounds = array<i64: 32, 32>}, {pipeline_mode = #tpu.pipeline_mode<synchronous>, transform_indices = @transform_6, window_bounds = array<i64: 32, 1>}, {pipeline_mode = #tpu.pipeline_mode<synchronous>, transform_indices = @transform_7, window_bounds = array<i64: 32, 1>}, {pipeline_mode = #tpu.pipeline_mode<synchronous>, transform_indices = @transform_8, window_bounds = array<i64: 1, 1>}, {transform_indices = @transform_9, window_bounds = array<i64: 1, 128>}]} {
    %c0 = arith.constant 0 : index
    %c0_0 = arith.constant 0 : index
    %0 = vector.load %arg1[%c0, %c0_0] : memref<4x128xf32, #tpu.memory_space<vmem>>, vector<4x128xf32>
    %c0_1 = arith.constant 0 : index
    %c0_2 = arith.constant 0 : index
    %1 = vector.load %arg2[%c0_1, %c0_2] : memref<32x4xf32, #tpu.memory_space<vmem>>, vector<32x4xf32>
    %2 = vector.extract_strided_slice %1 {offsets = [0, 0], sizes = [32, 1], strides = [1, 1]} : vector<32x4xf32> to vector<32x1xf32>
    %3 = vector.extract_strided_slice %0 {offsets = [0, 0], sizes = [1, 128], strides = [1, 1]} : vector<4x128xf32> to vector<1x128xf32>
    %4 = vector.broadcast %2 : vector<32x1xf32> to vector<32x128xf32>
    %5 = vector.broadcast %3 : vector<1x128xf32> to vector<32x128xf32>
    %6 = arith.mulf %4, %5 : vector<32x128xf32>
    %7 = vector.extract_strided_slice %1 {offsets = [0, 1], sizes = [32, 1], strides = [1, 1]} : vector<32x4xf32> to vector<32x1xf32>
    %8 = vector.extract_strided_slice %0 {offsets = [1, 0], sizes = [1, 128], strides = [1, 1]} : vector<4x128xf32> to vector<1x128xf32>
    %9 = vector.broadcast %7 : vector<32x1xf32> to vector<32x128xf32>
    %10 = vector.broadcast %8 : vector<1x128xf32> to vector<32x128xf32>
    %11 = arith.mulf %9, %10 : vector<32x128xf32>
    %12 = arith.addf %6, %11 : vector<32x128xf32>
    %13 = vector.extract_strided_slice %1 {offsets = [0, 2], sizes = [32, 1], strides = [1, 1]} : vector<32x4xf32> to vector<32x1xf32>
    %14 = vector.extract_strided_slice %0 {offsets = [2, 0], sizes = [1, 128], strides = [1, 1]} : vector<4x128xf32> to vector<1x128xf32>
    %15 = vector.broadcast %13 : vector<32x1xf32> to vector<32x128xf32>
    %16 = vector.broadcast %14 : vector<1x128xf32> to vector<32x128xf32>
    %17 = arith.mulf %15, %16 : vector<32x128xf32>
    %18 = arith.addf %12, %17 : vector<32x128xf32>
    %19 = vector.extract_strided_slice %1 {offsets = [0, 3], sizes = [32, 1], strides = [1, 1]} : vector<32x4xf32> to vector<32x1xf32>
    %20 = vector.extract_strided_slice %0 {offsets = [3, 0], sizes = [1, 128], strides = [1, 1]} : vector<4x128xf32> to vector<1x128xf32>
    %21 = vector.broadcast %19 : vector<32x1xf32> to vector<32x128xf32>
    %22 = vector.broadcast %20 : vector<1x128xf32> to vector<32x128xf32>
    %23 = arith.mulf %21, %22 : vector<32x128xf32>
    %24 = arith.addf %18, %23 : vector<32x128xf32>
    %c0_3 = arith.constant 0 : index
    %c0_4 = arith.constant 0 : index
    %25 = vector.load %arg3[%c0_3, %c0_4] : memref<32x1xf32, #tpu.memory_space<vmem>>, vector<32x1xf32>
    %26 = vector.broadcast %25 : vector<32x1xf32> to vector<32x128xf32>
    %27 = arith.addf %24, %26 : vector<32x128xf32>
    %cst = arith.constant 0.797884583 : f32
    %28 = vector.broadcast %cst : f32 to vector<32x128xf32>
    %29 = arith.mulf %28, %27 : vector<32x128xf32>
    %cst_5 = arith.constant 4.471500e-02 : f32
    %30 = vector.broadcast %cst_5 : f32 to vector<32x128xf32>
    %31 = arith.mulf %30, %27 : vector<32x128xf32>
    %32 = arith.mulf %31, %27 : vector<32x128xf32>
    %cst_6 = arith.constant 1.000000e+00 : f32
    %33 = vector.broadcast %cst_6 : f32 to vector<32x128xf32>
    %34 = arith.addf %33, %32 : vector<32x128xf32>
    %35 = arith.mulf %29, %34 : vector<32x128xf32>
    %cst_7 = arith.constant 5.000000e-01 : f32
    %36 = vector.broadcast %cst_7 : f32 to vector<32x128xf32>
    %37 = arith.mulf %36, %27 : vector<32x128xf32>
    %38 = math.tanh %35 : vector<32x128xf32>
    %cst_8 = arith.constant 1.000000e+00 : f32
    %39 = vector.broadcast %cst_8 : f32 to vector<32x128xf32>
    %40 = arith.addf %39, %38 : vector<32x128xf32>
    %41 = arith.mulf %37, %40 : vector<32x128xf32>
    %c0_9 = arith.constant 0 : index
    %c0_10 = arith.constant 0 : index
    %42 = vector.load %arg4[%c0_9, %c0_10] : memref<32x32xbf16, #tpu.memory_space<vmem>>, vector<32x32xbf16>
    %43 = arith.truncf %41 : vector<32x128xf32> to vector<32x128xbf16>
    %cst_11 = arith.constant dense<0.000000e+00> : vector<32x128xf32>
    %44 = tpu.matmul %42, %43, %cst_11 {dimension_numbers = #tpu.dot_dimension_numbers<[1], [0], [0], [1], [0, 0, 1, 1], [], []>} : vector<32x32xbf16>, vector<32x128xbf16>, vector<32x128xf32> -> vector<32x128xf32>
    %c0_12 = arith.constant 0 : index
    %c0_13 = arith.constant 0 : index
    %45 = vector.load %arg5[%c0_12, %c0_13] : memref<32x1xf32, #tpu.memory_space<vmem>>, vector<32x1xf32>
    %46 = vector.broadcast %45 : vector<32x1xf32> to vector<32x128xf32>
    %47 = arith.addf %44, %46 : vector<32x128xf32>
    %cst_14 = arith.constant 0.797884583 : f32
    %48 = vector.broadcast %cst_14 : f32 to vector<32x128xf32>
    %49 = arith.mulf %48, %47 : vector<32x128xf32>
    %cst_15 = arith.constant 4.471500e-02 : f32
    %50 = vector.broadcast %cst_15 : f32 to vector<32x128xf32>
    %51 = arith.mulf %50, %47 : vector<32x128xf32>
    %52 = arith.mulf %51, %47 : vector<32x128xf32>
    %cst_16 = arith.constant 1.000000e+00 : f32
    %53 = vector.broadcast %cst_16 : f32 to vector<32x128xf32>
    %54 = arith.addf %53, %52 : vector<32x128xf32>
    %55 = arith.mulf %49, %54 : vector<32x128xf32>
    %cst_17 = arith.constant 5.000000e-01 : f32
    %56 = vector.broadcast %cst_17 : f32 to vector<32x128xf32>
    %57 = arith.mulf %56, %47 : vector<32x128xf32>
    %58 = math.tanh %55 : vector<32x128xf32>
    %cst_18 = arith.constant 1.000000e+00 : f32
    %59 = vector.broadcast %cst_18 : f32 to vector<32x128xf32>
    %60 = arith.addf %59, %58 : vector<32x128xf32>
    %61 = arith.mulf %57, %60 : vector<32x128xf32>
    %c0_19 = arith.constant 0 : index
    %c0_20 = arith.constant 0 : index
    %62 = vector.load %arg6[%c0_19, %c0_20] : memref<32x32xbf16, #tpu.memory_space<vmem>>, vector<32x32xbf16>
    %63 = arith.truncf %61 : vector<32x128xf32> to vector<32x128xbf16>
    %cst_21 = arith.constant dense<0.000000e+00> : vector<32x128xf32>
    %64 = tpu.matmul %62, %63, %cst_21 {dimension_numbers = #tpu.dot_dimension_numbers<[1], [0], [0], [1], [0, 0, 1, 1], [], []>} : vector<32x32xbf16>, vector<32x128xbf16>, vector<32x128xf32> -> vector<32x128xf32>
    %c0_22 = arith.constant 0 : index
    %c0_23 = arith.constant 0 : index
    %65 = vector.load %arg7[%c0_22, %c0_23] : memref<32x1xf32, #tpu.memory_space<vmem>>, vector<32x1xf32>
    %66 = vector.broadcast %65 : vector<32x1xf32> to vector<32x128xf32>
    %67 = arith.addf %64, %66 : vector<32x128xf32>
    %cst_24 = arith.constant 0.797884583 : f32
    %68 = vector.broadcast %cst_24 : f32 to vector<32x128xf32>
    %69 = arith.mulf %68, %67 : vector<32x128xf32>
    %cst_25 = arith.constant 4.471500e-02 : f32
    %70 = vector.broadcast %cst_25 : f32 to vector<32x128xf32>
    %71 = arith.mulf %70, %67 : vector<32x128xf32>
    %72 = arith.mulf %71, %67 : vector<32x128xf32>
    %cst_26 = arith.constant 1.000000e+00 : f32
    %73 = vector.broadcast %cst_26 : f32 to vector<32x128xf32>
    %74 = arith.addf %73, %72 : vector<32x128xf32>
    %75 = arith.mulf %69, %74 : vector<32x128xf32>
    %cst_27 = arith.constant 5.000000e-01 : f32
    %76 = vector.broadcast %cst_27 : f32 to vector<32x128xf32>
    %77 = arith.mulf %76, %67 : vector<32x128xf32>
    %78 = math.tanh %75 : vector<32x128xf32>
    %cst_28 = arith.constant 1.000000e+00 : f32
    %79 = vector.broadcast %cst_28 : f32 to vector<32x128xf32>
    %80 = arith.addf %79, %78 : vector<32x128xf32>
    %81 = arith.mulf %77, %80 : vector<32x128xf32>
    %c0_29 = arith.constant 0 : index
    %c0_30 = arith.constant 0 : index
    %82 = vector.load %arg8[%c0_29, %c0_30] : memref<32x1xf32, #tpu.memory_space<vmem>>, vector<32x1xf32>
    %83 = vector.broadcast %82 : vector<32x1xf32> to vector<32x128xf32>
    %84 = arith.mulf %83, %81 : vector<32x128xf32>
    %cst_31 = arith.constant dense<0.000000e+00> : vector<128xf32>
    %85 = vector.multi_reduction <add>, %84, %cst_31 [0] : vector<32x128xf32> to vector<128xf32>
    %86 = vector.shape_cast %85 : vector<128xf32> to vector<1x128xf32>
    %c0_32 = arith.constant 0 : index
    %c0_33 = arith.constant 0 : index
    %87 = vector.load %arg9[%c0_32, %c0_33] : memref<1x1xf32, #tpu.memory_space<vmem>>, vector<1x1xf32>
    %88 = vector.broadcast %87 : vector<1x1xf32> to vector<1x128xf32>
    %89 = arith.addf %86, %88 : vector<1x128xf32>
    %cst_34 = arith.constant 0.000000e+00 : f32
    %90 = vector.broadcast %cst_34 : f32 to vector<1x128xf32>
    %91 = arith.subf %90, %89 : vector<1x128xf32>
    %92 = math.exp %91 : vector<1x128xf32>
    %cst_35 = arith.constant 1.000000e+00 : f32
    %93 = vector.broadcast %cst_35 : f32 to vector<1x128xf32>
    %94 = arith.addf %93, %92 : vector<1x128xf32>
    %cst_36 = arith.constant 1.000000e+00 : f32
    %95 = vector.broadcast %cst_36 : f32 to vector<1x128xf32>
    %96 = arith.divf %95, %94 : vector<1x128xf32>
    %c0_37 = arith.constant 0 : index
    %c0_38 = arith.constant 0 : index
    %97 = vector.load %arg10[%c0_37, %c0_38] : memref<1x128xf32, #tpu.memory_space<vmem>>, vector<1x128xf32>
    tpu.vector_store %arg10[%c0_37, %c0_38], %96 {strides = array<i32>} : memref<1x128xf32, #tpu.memory_space<vmem>>, vector<1x128xf32>,
    return
  }
  func.func @transform_0(%arg0: i32) -> (i32, i32) {
    %c0_i32 = arith.constant 0 : i32
    %c0_i32_0 = arith.constant 0 : i32
    return %c0_i32, %arg0 : i32, i32
  }
  func.func @transform_1(%arg0: i32) -> (i32, i32) {
    %c0_i32 = arith.constant 0 : i32
    %c0_i32_0 = arith.constant 0 : i32
    %c0_i32_1 = arith.constant 0 : i32
    return %c0_i32, %c0_i32_0 : i32, i32
  }
  func.func @transform_2(%arg0: i32) -> (i32, i32) {
    %c0_i32 = arith.constant 0 : i32
    %c0_i32_0 = arith.constant 0 : i32
    %c0_i32_1 = arith.constant 0 : i32
    return %c0_i32, %c0_i32_0 : i32, i32
  }
  func.func @transform_3(%arg0: i32) -> (i32, i32) {
    %c0_i32 = arith.constant 0 : i32
    %c0_i32_0 = arith.constant 0 : i32
    %c0_i32_1 = arith.constant 0 : i32
    return %c0_i32, %c0_i32_0 : i32, i32
  }
  func.func @transform_4(%arg0: i32) -> (i32, i32) {
    %c0_i32 = arith.constant 0 : i32
    %c0_i32_0 = arith.constant 0 : i32
    %c0_i32_1 = arith.constant 0 : i32
    return %c0_i32, %c0_i32_0 : i32, i32
  }
  func.func @transform_5(%arg0: i32) -> (i32, i32) {
    %c0_i32 = arith.constant 0 : i32
    %c0_i32_0 = arith.constant 0 : i32
    %c0_i32_1 = arith.constant 0 : i32
    return %c0_i32, %c0_i32_0 : i32, i32
  }
  func.func @transform_6(%arg0: i32) -> (i32, i32) {
    %c0_i32 = arith.constant 0 : i32
    %c0_i32_0 = arith.constant 0 : i32
    %c0_i32_1 = arith.constant 0 : i32
    return %c0_i32, %c0_i32_0 : i32, i32
  }
  func.func @transform_7(%arg0: i32) -> (i32, i32) {
    %c0_i32 = arith.constant 0 : i32
    %c0_i32_0 = arith.constant 0 : i32
    %c0_i32_1 = arith.constant 0 : i32
    return %c0_i32, %c0_i32_0 : i32, i32
  }
  func.func @transform_8(%arg0: i32) -> (i32, i32) {
    %c0_i32 = arith.constant 0 : i32
    %c0_i32_0 = arith.constant 0 : i32
    %c0_i32_1 = arith.constant 0 : i32
    return %c0_i32, %c0_i32_0 : i32, i32
  }
  func.func @transform_9(%arg0: i32) -> (i32, i32) {
    %c0_i32 = arith.constant 0 : i32
    %c0_i32_0 = arith.constant 0 : i32
    return %c0_i32, %arg0 : i32, i32
  }
}

</mosaic_0001>

<bundles_post_ra>
// kernel: trace_model_forward.1
= control target key start
LH: loop header
LB: loop body
LE: loop exit
PB: predicated region body
PF: predicated region fallthrough
CT: control target
= control target key end

     0   :  { %s1035_s11 = smov 0   ;;  %s1146_s0 = inlined_call_operand.vmem [shape: f32[4,256], index: 0, kind: input, shape index: {}]   ;;  %s1147_s1 = inlined_call_operand.vmem [shape: f32[32,4], index: 1, kind: input, shape index: {}]   ;;  %s1148_s2 = inlined_call_operand.vmem [shape: f32[32,1], index: 2, kind: input, shape index: {}]   ;;  %s1149_s3 = inlined_call_operand.vmem [shape: bf16[32,32], index: 3, kind: input, shape index: {}]   ;;  %s1150_s4 = inlined_call_operand.vmem [shape: f32[32,1], index: 4, kind: input, shape index: {}]   ;;  %s1151_s5 = inlined_call_operand.vmem [shape: bf16[32,32], index: 5, kind: input, shape index: {}]   ;;  %s1152_s6 = inlined_call_operand.vmem [shape: f32[32,1], index: 6, kind: input, shape index: {}]   ;;  %s1153_s7 = inlined_call_operand.vmem [shape: f32[32,1], index: 7, kind: input, shape index: {}]   ;;  %s1154_s8 = inlined_call_operand.<no memory space> [shape: f32[1,1], index: 8, kind: input, shape index: {}]   ;;  %s1155_s9 = inlined_call_operand.vmem [shape: f32[1,256], index: 9, kind: output, shape index: {}]  }
   0x1   :  { %v14_v0 = vstv %s1154_s8 }
   0x2   :  { %15 = vst [vmem:[#allocation2] sm:$0x1] %v14_v0 }
   0x3 LB: > { %s875_s12 = sadd.s32 4294967295, %s976_s11   ;;  %p879_p0 = scmp.ge.s32.totalorder %s976_s11, 1  ;;  %s976_s11 = sphi %s1035_s11, %s21_s11  }
   0x4   : > { %p288_p1 = scmp.lt.s32.totalorder %s976_s11, 3 }
   0x6   : > { %p289_p2 = pnand %p879_p0, %p288_p1 }
   0x7   : > { %p321_p3 = scmp.lt.s32.totalorder (!%p289_p2), %s875_s12, 1 }
   0x8   : > { %292 = sbr.rel (%p289_p2) target bundleno = 743 (0x2e7), region = 56 }
   0xd   : > { %v332_v1 = vld [vmem:[%s1147_s1 + $0x10] sm:$0xff]  ;;  %v978_v2 = vmov 3   ;;  %v979_v3 = vmov 1   ;;  %v333_v4 = vld [vmem:[%s1147_s1 + $0x18] sm:$0xff]  ;;  %v980_v5 = vmov 2   ;;  %v331_v6 = vld [vmem:[%s1147_s1 + $0x8] sm:$0xff]  ;;  %v354_v31 = vlaneseq }
   0xe   : > { %931 = vset.pattern.permute.xlu0 %v978_v2  ;;  %927 = vset.pattern.permute.xlu1 %v979_v3  ;;  %v330_v7 = vld [vmem:[%s1147_s1] sm:$0xff]  ;;  %v981_v8 = vmov 0   ;;  %v448_v9 = vld [vmem:[%s1148_s2 + $0x10] sm:$0xff]  ;;  %v447_v10 = vld [vmem:[%s1148_s2 + $0x8] sm:$0xff]  ;;  %vm550_vm0 = vcmask 261120   ;;  %s1157_s12 = smov (!%p321_p3, %s875_s12), 1 }
   0xf   : > { %427 = vperm.xlu0 %931, %v332_v1   ;;  %371 = vperm.xlu1 %927, %v332_v1   ;;  %v519_v11 = vld [vmem:[%s1150_s4 + $0x18] sm:$0xff]  ;;  %v517_v12 = vld [vmem:[%s1150_s4 + $0x8] sm:$0xff]  ;;  %v446_v17 = vld [vmem:[%s1148_s2] sm:$0xff]  ;;  %s880_s8 = sshll.u32 %s1157_s12, 2  ;;  %v1114_v34 = vshrl.u32 %v354_v31, 7  ;;  %s327_s26 = scalar_lea.vmem %s1155_s9, %s1157_s12 }
  0x10   : > { %v649_v13 = vld [vmem:[%s1152_s6 + $0x8] sm:$0xff]  ;;  %v651_v14 = vld [vmem:[%s1152_s6 + $0x18] sm:$0xff]  ;;  %v518_v19 = vld [vmem:[%s1150_s4 + $0x10] sm:$0xff]  ;;  %s324_s17 = scalar_lea.vmem %s1146_s0, %s880_s8 }
  0x11   : > { %v449_v15 = vld [vmem:[%s1148_s2 + $0x18] sm:$0xff]  ;;  %v774_v16 = vld [vmem:[%s1153_s7 + $0x8] sm:$0xff]  ;;  %v516_v20 = vld [vmem:[%s1150_s4] sm:$0xff]  ;;  %v356_v35 = vsub.s32 0, %v1114_v34  ;;  %v380_v36 = vsub.s32 1, %v1114_v34  ;;  %v408_v42 = vsub.s32 2, %v1114_v34 }
  0x12   : > { %v776_v18 = vld [vmem:[%s1153_s7 + $0x18] sm:$0xff]  ;;  %v648_v21 = vld [vmem:[%s1152_s6] sm:$0xff]  ;;  %v650_v22 = vld [vmem:[%s1152_s6 + $0x10] sm:$0xff]  ;;  %v436_v45 = vsub.s32 3, %v1114_v34 }
  0x13   : > { %932 = vset.pattern.permute.xlu0 %v980_v5  ;;  %375 = vperm.xlu1 %927, %v333_v4   ;;  %v773_v23 = vld [vmem:[%s1153_s7] sm:$0xff]  ;;  %v775_v24 = vld [vmem:[%s1153_s7 + $0x10] sm:$0xff] }
  0x14   : > { %399 = vperm.xlu0 %932, %v332_v1   ;;  %v810_v25 = vld [vmem:[#allocation2] sm:$0x1] }
  0x15   : > { %v938_v26 = vld [vmem:[%s1149_s3] sm:$0xff]  }
  0x16   : > { %903 = vmatprep.mubr.msk.bf16.mxu0 %vm550_vm0, %v938_v26  ;;  %v329_v39 = vld [vmem:[%s324_s17] sm:$0xf] }
  0x17   : > { %928 = vset.pattern.permute.xlu1 %v980_v5  ;;  %v357_v40 = vrot.slane %v329_v39, %v356_v35  ;;  %v381_v41 = vrot.slane %v329_v39, %v380_v36  ;;  %v409_v48 = vrot.slane %v329_v39, %v408_v42  ;;  %v437_v50 = vrot.slane %v329_v39, %v436_v45 }
  0x18   : > { %403 = vperm.xlu1 %928, %v333_v4   ;;  %395 = vperm.xlu0 %932, %v331_v6  }
  0x1c   : > { %929 = vset.pattern.permute.xlu1 %v981_v8  ;;  %935 = vset.pattern.permute.xlu0 %v981_v8 }
  0x1d   : > { %346 = vperm.xlu0 %935, %v332_v1   ;;  %336 = vperm.xlu1 %929, %v330_v7  }
  0x21   : > { %351 = vperm.xlu0 %935, %v333_v4   ;;  %930 = vset.pattern.permute.xlu1 %v979_v3 }
  0x22   : > { %363 = vperm.xlu1 %930, %v330_v7  }
  0x25   : > { %341 = vperm.xlu0 %935, %v331_v6  }
  0x26   : > { %367 = vperm.xlu1 %930, %v331_v6  }
  0x29   : > { %462 = vperm.xlu0 %935, %v448_v9  }
  0x2a   : > { %933 = vset.pattern.permute.xlu1 %v978_v2 }
  0x2b   : > { %431 = vperm.xlu1 %933, %v333_v4  }
  0x2d   : > { %457 = vperm.xlu0 %935, %v447_v10  }
  0x2f   : > { %934 = vset.pattern.permute.xlu1 %v980_v5 }
  0x30   : > { %391 = vperm.xlu1 %934, %v330_v7  }
  0x31   : > { %537 = vperm.xlu0 %935, %v519_v11  }
  0x34   : > { %936 = vset.pattern.permute.xlu1 %v978_v2 }
  0x35   : > { %527 = vperm.xlu0 %935, %v517_v12   ;;  %419 = vperm.xlu1 %936, %v330_v7  }
  0x39   : > { %659 = vperm.xlu0 %935, %v649_v13   ;;  %423 = vperm.xlu1 %936, %v331_v6  }
  0x3d   : > { %669 = vperm.xlu0 %935, %v651_v14   ;;  %937 = vset.pattern.permute.xlu1 %v981_v8 }
  0x3e   : > { %467 = vperm.xlu1 %937, %v449_v15  }
  0x41   : > { %784 = vperm.xlu0 %935, %v774_v16  }
  0x42   : > { %452 = vperm.xlu1 %937, %v446_v17  }
  0x45   : > { %794 = vperm.xlu0 %935, %v776_v18  }
  0x46   : > { %532 = vperm.xlu1 %937, %v518_v19  }
  0x4a   : > { %522 = vperm.xlu1 %937, %v516_v20  }
  0x4e   : > { %654 = vperm.xlu1 %937, %v648_v21  }
  0x52   : > { %664 = vperm.xlu1 %937, %v650_v22  }
  0x56   : > { %779 = vperm.xlu1 %937, %v773_v23  }
  0x5a   : > { %789 = vperm.xlu1 %937, %v775_v24  }
  0x5e   : > { %813 = vperm.xlu1 %937, %v810_v25  }
  0x8a   : > { %v372_v27 = vpop.permute.xlu1 %371  ;;  %v428_v28 = vpop.permute.xlu0 %427 }
  0x8b   : > { %v384_v47 = vmul.f32 %v381_v41, %v372_v27  ;;  %v440_v54 = vmul.f32 %v437_v50, %v428_v28 }
  0x8e   : > { %v376_v29 = vpop.permute.xlu1 %375 }
  0x8f   : > { %v400_v30 = vpop.permute.xlu0 %399  ;;  %v385_v0 = vmul.f32 %v381_v41, %v376_v29 }
  0x90   : > { %v412_v51 = vmul.f32 %v409_v48, %v400_v30 }
  0x93   : > { %v404_v32 = vpop.permute.xlu1 %403  ;;  %v396_v33 = vpop.permute.xlu0 %395 }
  0x94   : > { %v411_v3 = vmul.f32 %v409_v48, %v396_v33  ;;  %v413_v6 = vmul.f32 %v409_v48, %v404_v32 }
  0x98   : > { %v347_v37 = vpop.permute.xlu0 %346  ;;  %v337_v38 = vpop.permute.xlu1 %336 }
  0x99   : > { %v360_v46 = vmul.f32 %v357_v40, %v347_v37  ;;  %v358_v13 = vmul.f32 %v357_v40, %v337_v38 }
  0x9b   : > { %v388_v52 = vadd.f32 %v384_v47, %v360_v46 }
  0x9c   : > { %v352_v43 = vpop.permute.xlu0 %351 }
  0x9d   : > { %v364_v44 = vpop.permute.xlu1 %363  ;;  %v416_v55 = vadd.f32 %v412_v51, %v388_v52  ;;  %v361_v63 = vmul.f32 %v357_v40, %v352_v43 }
  0x9e   : > { %v382_v7 = vmul.f32 %v381_v41, %v364_v44 }
  0x9f   : > { %v444_v58 = vadd.f32 %v440_v54, %v416_v55  ;;  %v389_v5 = vadd.f32 %v385_v0, %v361_v63 }
  0xa0   : > { %v342_v53 = vpop.permute.xlu0 %341  ;;  %v386_v17 = vadd.f32 %v382_v7, %v358_v13 }
  0xa1   : > { %v368_v49 = vpop.permute.xlu1 %367  ;;  %v359_v61 = vmul.f32 %v357_v40, %v342_v53  ;;  %v417_v15 = vadd.f32 %v413_v6, %v389_v5 }
  0xa2   : > { %v383_v62 = vmul.f32 %v381_v41, %v368_v49 }
  0xa4   : > { %v463_v57 = vpop.permute.xlu0 %462  ;;  %v387_v4 = vadd.f32 %v383_v62, %v359_v61 }
  0xa5   : > { %v472_v60 = vadd.f32 %v463_v57, %v444_v58 }
  0xa6   : > { %v432_v56 = vpop.permute.xlu1 %431  ;;  %v415_v11 = vadd.f32 %v411_v3, %v387_v4  ;;  %v940_v3 = vld [vmem:[%s1151_s5] sm:$0xff]  }
  0xa7   : > { %v480_v1 = vmul.f32 0.044715, %v472_v60  ;;  %v441_v9 = vmul.f32 %v437_v50, %v432_v56  ;;  %v476_v24 = vmul.f32 0.7978846, %v472_v60  ;;  %v496_v52 = vmul.f32 0.5, %v472_v60  ;;  %911 = vmatprep.mubr.msk.bf16.mxu1 %vm550_vm0, %v940_v3 }
  0xa8   : > { %v458_v19 = vpop.permute.xlu0 %457 }
  0xa9   : > { %v484_v8 = vmul.f32 %v480_v1, %v472_v60  ;;  %v445_v21 = vadd.f32 %v441_v9, %v417_v15  ;;  %v939_v60 = vld [vmem:[%s1149_s3 + $0x8] sm:$0xff]  }
  0xab   : > { %v392_v59 = vpop.permute.xlu1 %391  ;;  %v488_v18 = vadd.f32 1.0, %v484_v8 }
  0xac   : > { %v410_v14 = vmul.f32 %v409_v48, %v392_v59  ;;  %v538_v6 = vpop.permute.xlu0 %537 }
  0xad   : > { %v492_v30 = vmul.f32 %v488_v18, %v476_v24 }
  0xae   : > { %v414_v25 = vadd.f32 %v410_v14, %v386_v17 }
  0xaf   : > { %942 = vtanh.f32 %v492_v30 }
  0xb0   : > { %v420_v2 = vpop.permute.xlu1 %419  ;;  %v528_v17 = vpop.permute.xlu0 %527 }
  0xb1   : > { %v438_v20 = vmul.f32 %v437_v50, %v420_v2 }
  0xb3   : > { %v442_v29 = vadd.f32 %v438_v20, %v414_v25 }
  0xb4   : > { %v424_v10 = vpop.permute.xlu1 %423 }
  0xb5   : > { %v439_v12 = vmul.f32 %v437_v50, %v424_v10 }
  0xb7   : > { %v443_v16 = vadd.f32 %v439_v12, %v415_v11 }
  0xb9   : > { %v471_v22 = vadd.f32 %v458_v19, %v443_v16  ;;  %v468_v23 = vpop.permute.xlu1 %467 }
  0xba   : > { %v473_v26 = vadd.f32 %v468_v23, %v445_v21 }
  0xbb   : > { %v479_v27 = vmul.f32 0.044715, %v471_v22  ;;  %v475_v37 = vmul.f32 0.7978846, %v471_v22  ;;  %v495_v62 = vmul.f32 0.5, %v471_v22 }
  0xbc   : > { %v481_v28 = vmul.f32 0.044715, %v473_v26  ;;  %v477_v39 = vmul.f32 0.7978846, %v473_v26  ;;  %v943_v48 = vpop.eup %942  ;;  %v497_v53 = vmul.f32 0.5, %v473_v26 }
  0xbd   : > { %v483_v31 = vmul.f32 %v479_v27, %v471_v22  ;;  %v453_v32 = vpop.permute.xlu1 %452  ;;  %v504_v50 = vadd.f32 1.0, %v943_v48 }
  0xbe   : > { %v485_v33 = vmul.f32 %v481_v28, %v473_v26  ;;  %v470_v36 = vadd.f32 %v453_v32, %v442_v29 }
  0xbf   : > { %v487_v38 = vadd.f32 1.0, %v483_v31  ;;  %v508_v55 = vmul.f32 %v504_v50, %v496_v52 }
  0xc0   : > { %v489_v40 = vadd.f32 1.0, %v485_v33  ;;  %v478_v41 = vmul.f32 0.044715, %v470_v36  ;;  %v474_v45 = vmul.f32 0.7978846, %v470_v36  ;;  %v494_v61 = vmul.f32 0.5, %v470_v36 }
  0xc1   : > { %v491_v42 = vmul.f32 %v487_v38, %v475_v37  ;;  %v533_v4 = vpop.permute.xlu1 %532 }
  0xc2   : > { %v482_v43 = vmul.f32 %v478_v41, %v470_v36  ;;  %v493_v44 = vmul.f32 %v489_v40, %v477_v39 }
  0xc3   : > { %944 = vtanh.f32 %v491_v42 }
  0xc4   : > { %v486_v46 = vadd.f32 1.0, %v482_v43  ;;  %946 = vtanh.f32 %v493_v44 }
  0xc5   : > { %v523_v8 = vpop.permute.xlu1 %522 }
  0xc6   : > { %v490_v47 = vmul.f32 %v486_v46, %v474_v45 }
  0xc8   : > { %948 = vtanh.f32 %v490_v47 }
  0xd0   : > { %v945_v49 = vpop.eup %944 }
  0xd1   : > { %v947_v51 = vpop.eup %946  ;;  %v503_v57 = vadd.f32 1.0, %v945_v49 }
  0xd2   : > { %v505_v54 = vadd.f32 1.0, %v947_v51 }
  0xd3   : > { %v507_v1 = vmul.f32 %v503_v57, %v495_v62  ;;  %v655_v57 = vpop.permute.xlu1 %654 }
  0xd4   : > { %v509_v56 = vmul.f32 %v505_v54, %v497_v53 }
  0xd5   : > { %v949_v58 = vpop.eup %948 }
  0xd6   : > { %v515_v59 = vpack.c.bf16 %v509_v56, %v508_v55  ;;  %v502_v63 = vadd.f32 1.0, %v949_v58  ;;  %v941_v56 = vld [vmem:[%s1151_s5 + $0x8] sm:$0xff]   ;;  %v660_v58 = vpop.permute.xlu0 %659 }
  0xd8   : > { %899 = vmatprep.subr.bf16.mxu0 %v515_v59  ;;  %v506_v0 = vmul.f32 %v502_v63, %v494_v61 }
  0xd9   : > { %900 = vmatpush3.bf16.msra.mxu0 %v515_v59  ;;  %v665_v59 = vpop.permute.xlu1 %664 }
  0xda   : > { %v514_v2 = vpack.c.bf16 %v507_v1, %v506_v0 }
  0xdc   : > { %901 = vmatprep.subr.bf16.mxu0 %v514_v2 }
  0xdd   : > { %902 = vmatpush3.bf16.msra.mxu0 %v514_v2 }
  0xe0   : > { %904 = vmatmul.mubr.msk.bf16.vlgmr.msra.gmra.mxu0 %vm550_vm0, %v939_v60  ;;  %v670_v60 = vpop.permute.xlu0 %669 }
 0x1a0   : > { %v905_v5 = vpop.f32.mrf.mxu0 }
 0x1a1   : > { %v600_v7 = vadd.f32 %v905_v5, %v533_v4 }
 0x1a2   : > { %v591_v9 = vpop.f32.mrf.mxu0 }
 0x1a3   : > { %v612_v10 = vmul.f32 0.044715, %v600_v7  ;;  %v592_v11 = vadd.f32 %v591_v9, %v523_v8  ;;  %v608_v18 = vmul.f32 0.7978846, %v600_v7  ;;  %v628_v42 = vmul.f32 0.5, %v600_v7 }
 0x1a4   : > { %v906_v12 = vpop.f32.mrf.mxu0 }
 0x1a5   : > { %v616_v13 = vmul.f32 %v612_v10, %v600_v7  ;;  %v610_v14 = vmul.f32 0.044715, %v592_v11  ;;  %v603_v15 = vadd.f32 %v906_v12, %v538_v6  ;;  %v606_v23 = vmul.f32 0.7978846, %v592_v11 }
 0x1a6   : > { %v594_v16 = vpop.f32.mrf.mxu0  ;;  %v626_v49 = vmul.f32 0.5, %v592_v11 }
 0x1a7   : > { %v620_v19 = vadd.f32 1.0, %v616_v13  ;;  %v614_v20 = vmul.f32 %v610_v14, %v592_v11  ;;  %v613_v21 = vmul.f32 0.044715, %v603_v15  ;;  %v595_v22 = vadd.f32 %v594_v16, %v528_v17 }
 0x1a8   : > { %v609_v29 = vmul.f32 0.7978846, %v603_v15  ;;  %v629_v43 = vmul.f32 0.5, %v603_v15 }
 0x1a9   : > { %v618_v24 = vadd.f32 1.0, %v614_v20  ;;  %v617_v25 = vmul.f32 %v613_v21, %v603_v15  ;;  %v624_v26 = vmul.f32 %v620_v19, %v608_v18  ;;  %v611_v27 = vmul.f32 0.044715, %v595_v22 }
 0x1aa   : > { %v607_v33 = vmul.f32 0.7978846, %v595_v22  ;;  %v627_v50 = vmul.f32 0.5, %v595_v22 }
 0x1ab   : > { %v622_v28 = vmul.f32 %v618_v24, %v606_v23  ;;  %v621_v30 = vadd.f32 1.0, %v617_v25  ;;  %950 = vtanh.f32 %v624_v26  ;;  %v615_v31 = vmul.f32 %v611_v27, %v595_v22 }
 0x1ad   : > { %v625_v32 = vmul.f32 %v621_v30, %v609_v29  ;;  %952 = vtanh.f32 %v622_v28  ;;  %v619_v36 = vadd.f32 1.0, %v615_v31 }
 0x1af   : > { %954 = vtanh.f32 %v625_v32  ;;  %v623_v37 = vmul.f32 %v619_v36, %v607_v33  ;;  %v780_v32 = vpop.permute.xlu1 %779 }
 0x1b1   : > { %956 = vtanh.f32 %v623_v37 }
 0x1b8   : > { %v951_v38 = vpop.eup %950 }
 0x1b9   : > { %v636_v40 = vadd.f32 1.0, %v951_v38 }
 0x1ba   : > { %v953_v39 = vpop.eup %952 }
 0x1bb   : > { %v634_v45 = vadd.f32 1.0, %v953_v39  ;;  %v640_v47 = vmul.f32 %v636_v40, %v628_v42  ;;  %v785_v40 = vpop.permute.xlu0 %784 }
 0x1bc   : > { %v955_v41 = vpop.eup %954 }
 0x1bd   : > { %v637_v44 = vadd.f32 1.0, %v955_v41  ;;  %v638_v53 = vmul.f32 %v634_v45, %v626_v49 }
 0x1be   : > { %v957_v46 = vpop.eup %956 }
 0x1bf   : > { %v641_v48 = vmul.f32 %v637_v44, %v629_v43  ;;  %v635_v51 = vadd.f32 1.0, %v957_v46 }
 0x1c1   : > { %v647_v52 = vpack.c.bf16 %v641_v48, %v640_v47  ;;  %v639_v54 = vmul.f32 %v635_v51, %v627_v50  ;;  %v790_v47 = vpop.permute.xlu1 %789  ;;  %v795_v50 = vpop.permute.xlu0 %794 }
 0x1c3   : > { %907 = vmatprep.subr.bf16.mxu1 %v647_v52  ;;  %v646_v55 = vpack.c.bf16 %v639_v54, %v638_v53 }
 0x1c4   : > { %908 = vmatpush3.bf16.msra.mxu1 %v647_v52 }
 0x1c5   : > { %909 = vmatprep.subr.bf16.mxu1 %v646_v55 }
 0x1c8   : > { %910 = vmatpush3.bf16.msra.mxu1 %v646_v55 }
 0x1cb   : > { %912 = vmatmul.mubr.msk.bf16.vlgmr.msra.gmra.mxu1 %vm550_vm0, %v941_v56 }
 0x28b   : > { %v913_v61 = vpop.f32.mrf.mxu1 }
 0x28c   : > { %v731_v62 = vadd.f32 %v913_v61, %v665_v59 }
 0x28d   : > { %v722_v63 = vpop.f32.mrf.mxu1 }
 0x28e   : > { %v743_v0 = vmul.f32 0.044715, %v731_v62  ;;  %v723_v1 = vadd.f32 %v722_v63, %v655_v57  ;;  %v739_v7 = vmul.f32 0.7978846, %v731_v62  ;;  %v759_v33 = vmul.f32 0.5, %v731_v62 }
 0x28f   : > { %v914_v2 = vpop.f32.mrf.mxu1 }
 0x290   : > { %v747_v3 = vmul.f32 %v743_v0, %v731_v62  ;;  %v741_v4 = vmul.f32 0.044715, %v723_v1  ;;  %v734_v5 = vadd.f32 %v914_v2, %v670_v60  ;;  %v737_v13 = vmul.f32 0.7978846, %v723_v1 }
 0x291   : > { %v725_v6 = vpop.f32.mrf.mxu1  ;;  %v757_v30 = vmul.f32 0.5, %v723_v1 }
 0x292   : > { %v751_v8 = vadd.f32 1.0, %v747_v3  ;;  %v745_v9 = vmul.f32 %v741_v4, %v723_v1  ;;  %v726_v10 = vadd.f32 %v725_v6, %v660_v58  ;;  %v744_v11 = vmul.f32 0.044715, %v734_v5  ;;  %v814_v58 = vpop.permute.xlu1 %813 }
 0x293   : > { %v740_v19 = vmul.f32 0.7978846, %v734_v5  ;;  %v760_v42 = vmul.f32 0.5, %v734_v5  ;;  %v819_v61 = vrot.slane %v814_v58, %v356_v35 }
 0x294   : > { %v755_v12 = vmul.f32 %v751_v8, %v739_v7  ;;  %v749_v14 = vadd.f32 1.0, %v745_v9  ;;  %v742_v15 = vmul.f32 0.044715, %v726_v10  ;;  %v748_v16 = vmul.f32 %v744_v11, %v734_v5 }
 0x295   : > { %v738_v21 = vmul.f32 0.7978846, %v726_v10  ;;  %v758_v38 = vmul.f32 0.5, %v726_v10 }
 0x296   : > { %v753_v17 = vmul.f32 %v749_v14, %v737_v13  ;;  %v746_v18 = vmul.f32 %v742_v15, %v726_v10  ;;  %958 = vtanh.f32 %v755_v12  ;;  %v752_v20 = vadd.f32 1.0, %v748_v16 }
 0x298   : > { %960 = vtanh.f32 %v753_v17  ;;  %v750_v22 = vadd.f32 1.0, %v746_v18  ;;  %v756_v23 = vmul.f32 %v752_v20, %v740_v19 }
 0x29a   : > { %v754_v24 = vmul.f32 %v750_v22, %v738_v21  ;;  %962 = vtanh.f32 %v756_v23 }
 0x29c   : > { %964 = vtanh.f32 %v754_v24 }
 0x2a3   : > { %v959_v25 = vpop.eup %958 }
 0x2a4   : > { %v767_v29 = vadd.f32 1.0, %v959_v25 }
 0x2a5   : > { %v961_v26 = vpop.eup %960 }
 0x2a6   : > { %v765_v27 = vadd.f32 1.0, %v961_v26  ;;  %v771_v41 = vmul.f32 %v767_v29, %v759_v33 }
 0x2a7   : > { %v963_v28 = vpop.eup %962 }
 0x2a8   : > { %v769_v36 = vmul.f32 %v765_v27, %v757_v30  ;;  %v768_v37 = vadd.f32 1.0, %v963_v28  ;;  %v799_v48 = vmul.f32 %v790_v47, %v771_v41 }
 0x2a9   : > { %v965_v31 = vpop.eup %964 }
 0x2aa   : > { %v766_v39 = vadd.f32 1.0, %v965_v31  ;;  %v797_v44 = vmul.f32 %v780_v32, %v769_v36  ;;  %v772_v45 = vmul.f32 %v768_v37, %v760_v42 }
 0x2ac   : > { %v770_v43 = vmul.f32 %v766_v39, %v758_v38  ;;  %v800_v51 = vmul.f32 %v795_v50, %v772_v45 }
 0x2ae   : > { %v798_v46 = vmul.f32 %v785_v40, %v770_v43 }
 0x2b0   : > { %v801_v49 = vadd.f32 %v798_v46, %v797_v44 }
 0x2b2   : > { %v802_v52 = vadd.f32 %v801_v49, %v799_v48 }
 0x2b4   : > { %v803_v53 = vadd.f32 %v802_v52, %v800_v51 }
 0x2b6   : > { %v804_v54 = vrot.slane %v803_v53, 4 }
 0x2b8   : > { %v805_v55 = vadd.f32 %v804_v54, %v803_v53 }
 0x2ba   : > { %v806_v56 = vrot.slane %v805_v55, 2 }
 0x2bc   : > { %v807_v57 = vadd.f32 %v806_v56, %v805_v55 }
 0x2be   : > { %v808_v59 = vrot.slane %v807_v57, 1 }
 0x2c0   : > { %v809_v62 = vadd.f32 %v808_v59, %v807_v57 }
 0x2c2   : > { %v820_v63 = vadd.f32 %v819_v61, %v809_v62 }
 0x2c4   : > { %v821_v0 = vsub.f32 0.0, %v820_v63 }
 0x2c6   : > { %v822_v1 = vmul.f32 1.442695, %v821_v0 }
 0x2c8   : > { %966 = vpow2.f32 %v822_v1 }
 0x2d5   : > { %v967_v2 = vpop.eup %966 }
 0x2d6   : > { %v824_v60 = vadd.f32 1.0, %v967_v2 }
 0x2d8   : > { %968 = vrcp.f32 %v824_v60 }
 0x2e5   : > { %v969_v3 = vpop.eup %968 }
 0x2e6   : > { %827 = vst [vmem:[%s327_s26] sm:$0x1] %v969_v3 }
 0x2e7 PF: > { %s21_s11 = sadd.s32 1, %s976_s11  }
 0x2e8   : > { %p18_p4 = scmp.ge.s32.totalorder %s21_s11, 4  }
 0x2ea   :  { %20 = sbr.rel (!%p18_p4) target bundleno = 3 (0x3), region = 86 }

</bundles_post_ra>
